<compile_context>
chip_gen: v6e
topology: v6e:2x2x1
jax: 0.10.0
libtpu: 0.0.40
codegen_flags: <defaults>
</compile_context>

<pallas_src>
import jax
import jax.numpy as jnp
from jax.experimental import pallas as pl
from jax.experimental.pallas import tpu as pltpu


def _make_colsum_kernel(rows, bm, steps):
    """Build the streaming column-sum kernel for a (rows, 128) input."""
    last = steps - 1
    valid_last = rows - last * bm          # valid rows in the final block
    has_partial = valid_last != bm         # static: do we need to mask at all?

    def kernel(x_ref, o_ref):
        i = pl.program_id(0)

        @pl.when(i == 0)
        def _():
            o_ref[...] = jnp.zeros_like(o_ref)

        def accumulate(xb):
            # Fold bm rows onto 8 sublanes: pure vadds, no cross-lane traffic.
            o_ref[...] += jnp.sum(xb.reshape(bm // 8, 8, 128), axis=0)

        if has_partial:
            @pl.when(i != last)
            def _():
                accumulate(x_ref[...].astype(jnp.float32))

            @pl.when(i == last)
            def _():
                # Pallas pads the ragged edge block with unspecified data; mask
                # it with a select (NOT a multiply — garbage could be NaN/Inf).
                row_id = jax.lax.broadcasted_iota(jnp.int32, (bm, 128), 0)
                xb = jnp.where(row_id < valid_last,
                               x_ref[...].astype(jnp.float32), 0.0)
                accumulate(xb)
        else:
            accumulate(x_ref[...].astype(jnp.float32))

    return kernel


def model_a_forward(q, w, b, *, block_rows=8192, fastpath_max_bytes=1 << 20):
    """Pallas implementation of ModelA.forward.

    q: (B, A, S, 8) input
    w: (8, 8) Linear weight (PyTorch convention: out_features x in_features)
    b: (8,)  Linear bias
    returns (l, l_data) — both scalar f32, matching (l, l.data) in the reference.
    """
    F = q.shape[-1]
    assert F == 8, "ModelA uses nn.Linear(8, 8)"
    assert 128 % F == 0
    M = 1
    for d in q.shape[:-1]:
        M *= d
    total = M * F
    f32 = jnp.float32
    itemsize = jnp.dtype(q.dtype).itemsize

    # Fold Linear(8,8): wsum[i] = sum_o W[o, i]; bias contributes M * sum(b).
    wsum = jnp.sum(w.astype(f32), axis=0)                 # (8,)
    bias_term = f32(M) * jnp.sum(b.astype(f32))

    rows = total // 128                                   # full lane-dense rows
    in_bytes = total * itemsize

    # Tiny-input fast path: kernel launch/grid overhead would dominate.
    if rows < 8 or in_bytes < fastpath_max_bytes:
        col = jnp.sum(q.reshape(M, F).astype(f32), axis=0)
        l = jnp.dot(col, wsum) + bias_term
        return l, jax.lax.stop_gradient(l)

    # Split off the <128-element remainder (only when M % 16 != 0); the 128-aligned
    # bulk is a pure bitcast reshape of the contiguous input when there is no
    # remainder — no pad, no extra HBM copy.
    rem_elems = total - rows * 128
    if rem_elems:
        x_flat = q.reshape(-1)
        bulk = jax.lax.slice(x_flat, (0,), (rows * 128,)).reshape(rows, 128)
        rem = jax.lax.slice(x_flat, (rows * 128,), (total,)).reshape(-1, F)
        rem_contrib = jnp.dot(jnp.sum(rem.astype(f32), axis=0), wsum)
    else:
        bulk = q.reshape(rows, 128)                       # bitcast, no copy
        rem_contrib = f32(0)

    # Big lane-dense blocks (default 8192 x 128 f32 = 4 MiB, 8 MiB double-buffered)
    # amortize the ~0.35 us per-step overhead; bm stays a multiple of 8.
    bm = max(8, (min(block_rows, rows) // 8) * 8)
    steps = pl.cdiv(rows, bm)
    block_bytes = bm * 128 * itemsize

    partial = pl.pallas_call(
        _make_colsum_kernel(rows, bm, steps),
        out_shape=jax.ShapeDtypeStruct((8, 128), f32),
        grid_spec=pltpu.PrefetchScalarGridSpec(
            num_scalar_prefetch=0,
            grid=(steps,),
            in_specs=[pl.BlockSpec((bm, 128), lambda i: (i, 0))],
            out_specs=pl.BlockSpec((8, 128), lambda i: (0, 0)),
        ),
        compiler_params=pltpu.CompilerParams(
            dimension_semantics=("arbitrary",),           # reduction axis
            vmem_limit_bytes=int(2 * block_bytes + (4 << 20)),
        ),
        cost_estimate=pl.CostEstimate(
            flops=rows * 128,
            transcendentals=0,
            bytes_accessed=rows * 128 * itemsize + 8 * 128 * 4,
        ),
    )(bulk)

    # Epilogue: apply folded weights (lane j carries feature j % 8), add remainder
    # and bias contributions.
    w_lane = jnp.tile(wsum, 128 // F)                     # (128,)
    l = jnp.sum(partial * w_lane[None, :]) + rem_contrib + bias_term
    # (l, l.data): .data is the same value without autograd tracking.
    return l, jax.lax.stop_gradient(l)


if __name__ == "__main__":
    key = jax.random.PRNGKey(0)
    kq, kw, kb = jax.random.split(key, 3)

    F = 8
    # Deterministic Linear(8, 8) parameters (PyTorch-style uniform(-1/sqrt(8), 1/sqrt(8))).
    bound = 1.0 / jnp.sqrt(jnp.float32(F))
    w = jax.random.uniform(kw, (F, F), minval=-bound, maxval=bound, dtype=jnp.float32)
    b = jax.random.uniform(kb, (F,), minval=-bound, maxval=bound, dtype=jnp.float32)

    def ref_fn(x):
        return jnp.sum(x.reshape(-1, F) @ w.T + b)

    # 1) Small canonical shape; force the Pallas path (disable tiny-input fast path).
    q1 = jax.random.normal(kq, (2, 4, 16, F), dtype=jnp.float32)
    l1, l1_data = model_a_forward(q1, w, b, fastpath_max_bytes=0)
    jax.block_until_ready((l1, l1_data))
    r1 = ref_fn(q1)
    assert jnp.allclose(l1, r1, rtol=1e-5, atol=1e-4), (l1, r1)
    assert jnp.allclose(l1_data, r1, rtol=1e-5, atol=1e-4)

    # 2) Awkward M (not a multiple of 16): wrapper remainder / fast-path handling.
    q2 = jax.random.normal(kq, (3, 5, 7, F), dtype=jnp.float32)
    l2, _ = model_a_forward(q2, w, b)
    jax.block_until_ready(l2)
    r2 = ref_fn(q2)
    assert jnp.allclose(l2, r2, rtol=1e-5, atol=1e-4), (l2, r2)

    # 3) Multi-step grid with a masked partial last block (rows=2200, bm=512).
    q3 = jax.random.normal(kq, (4, 8, 1100, F), dtype=jnp.float32)
    l3, _ = model_a_forward(q3, w, b, block_rows=512, fastpath_max_bytes=0)
    jax.block_until_ready(l3)
    r3 = ref_fn(q3)
    assert jnp.allclose(l3, r3, rtol=5e-5, atol=5e-3), (l3, r3)

    # 4) Default configuration on a ~2 MiB input (above the fast-path threshold).
    q4 = jax.random.normal(kq, (4, 8, 2048, F), dtype=jnp.float32)
    l4, _ = model_a_forward(q4, w, b)
    jax.block_until_ready(l4)
    r4 = ref_fn(q4)
    assert jnp.allclose(l4, r4, rtol=5e-5, atol=5e-3), (l4, r4)

    print("KERNEL_OK")
</pallas_src>

<mosaic_0001>
module attributes {stable_mosaic.version = 11 : i64} {
  func.func @kernel(%arg0: i32, %arg1: memref<8x128xf32, #tpu.memory_space<vmem>>, %arg2: memref<8x128xf32, #tpu.memory_space<vmem>>) attributes {dimension_semantics = [#tpu.dimension_semantics<arbitrary>], iteration_bounds = array<i64: 1>, scalar_prefetch = 0 : i64, scratch_operands = 0 : i64, tpu.core_type = #tpu.core_type<tc>, window_params = [{transform_indices = @transform_0, window_bounds = array<i64: 8, 128>}, {pipeline_mode = #tpu.pipeline_mode<synchronous>, transform_indices = @transform_1, window_bounds = array<i64: 8, 128>}]} {
    %c0_i32 = arith.constant 0 : i32
    %0 = arith.cmpi eq, %arg0, %c0_i32 : i32
    %1 = arith.extui %0 : i1 to i32
    %c0_i32_0 = arith.constant 0 : i32
    %2 = arith.cmpi ne, %1, %c0_i32_0 : i32
    scf.if %2 {
      %cst_6 = arith.constant 0.000000e+00 : f32
      %9 = vector.broadcast %cst_6 : f32 to vector<8x128xf32>
      %c0_7 = arith.constant 0 : index
      %c0_8 = arith.constant 0 : index
      %10 = vector.load %arg2[%c0_7, %c0_8] : memref<8x128xf32, #tpu.memory_space<vmem>>, vector<8x128xf32>
      tpu.vector_store %arg2[%c0_7, %c0_8], %9 {strides = array<i32>} : memref<8x128xf32, #tpu.memory_space<vmem>>, vector<8x128xf32>,
    } else {
    }
    %c0 = arith.constant 0 : index
    %c0_1 = arith.constant 0 : index
    %3 = vector.load %arg1[%c0, %c0_1] : memref<8x128xf32, #tpu.memory_space<vmem>>, vector<8x128xf32>
    %c0_2 = arith.constant 0 : index
    %c0_3 = arith.constant 0 : index
    %4 = vector.load %arg2[%c0_2, %c0_3] : memref<8x128xf32, #tpu.memory_space<vmem>>, vector<8x128xf32>
    %5 = vector.shape_cast %3 : vector<8x128xf32> to vector<1x8x128xf32>
    %cst = arith.constant dense<0.000000e+00> : vector<8x128xf32>
    %6 = vector.multi_reduction <add>, %5, %cst [0] : vector<1x8x128xf32> to vector<8x128xf32>
    %7 = arith.addf %4, %6 : vector<8x128xf32>
    %c0_4 = arith.constant 0 : index
    %c0_5 = arith.constant 0 : index
    %8 = vector.load %arg2[%c0_4, %c0_5] : memref<8x128xf32, #tpu.memory_space<vmem>>, vector<8x128xf32>
    tpu.vector_store %arg2[%c0_4, %c0_5], %7 {strides = array<i32>} : memref<8x128xf32, #tpu.memory_space<vmem>>, vector<8x128xf32>,
    return
  }
  func.func @transform_0(%arg0: i32) -> (i32, i32) {
    %c0_i32 = arith.constant 0 : i32
    %c0_i32_0 = arith.constant 0 : i32
    return %arg0, %c0_i32 : i32, i32
  }
  func.func @transform_1(%arg0: i32) -> (i32, i32) {
    %c0_i32 = arith.constant 0 : i32
    %c0_i32_0 = arith.constant 0 : i32
    %c0_i32_1 = arith.constant 0 : i32
    return %c0_i32, %c0_i32_0 : i32, i32
  }
}

</mosaic_0001>

<bundles_post_ra>
// kernel: tpu_custom_call.1
= control target key start
LH: loop header
LB: loop body
LE: loop exit
PB: predicated region body
PF: predicated region fallthrough
CT: control target
= control target key end

     0   :  { %6 = vsyncpa [#allocation3], 0  ;;  %s111_s0 = inlined_call_operand.hbm [shape: f32[8,128], index: 0, kind: input, shape index: {}]   ;;  %s112_s1 = inlined_call_operand.hbm [shape: f32[8,128], index: 1, kind: output, shape index: {}]  }
   0x1   :  { %7 = vsyncpa [#allocation4], 0  ;;  %s93_s6 = smov [#allocation2]  }
   0x2   :  { %s14_s7 = sshll.u32 %s93_s6, 4  ;;  %s15_s7 = int_to_ptr.vmem [resolvable:$true] %s14_s7 }
   0x3   :  { %s57_s8 = scalar_lea.vmem %s15_s7, 128  ;;  %p62_p1 = scmp.lt.s32.totalorder %s15_s7, %s15_s7 }
   0x4   :  { %p58_p0 = scmp.ne.s32.totalorder %s15_s7, %s57_s8  ;;  %p63_p2 = scmp.lt.s32.totalorder %s57_s8, %s57_s8 }
   0x6   :  { %p64_p3 = por %p63_p2, %p62_p1 }
   0x8   :  { %p65_p4 = pnand %p64_p3, %p58_p0 }
   0xa   :  { %68 = shalt.err (!%p65_p4)
}
   0xb   :  { %17 = dma.hbm_to_vmem [thread:$0]  %s111_s0, 128, %s15_s7, [#allocation3]  }
   0xc   :  { %89 = dma.done.wait [#allocation3], 128  }
   0xd   :  { %90 = vsyncadd [#allocation3], 4294967168  ;;  %s94_s11 = smov [#allocation5]   ;;  %v26_v0 = vld [vmem:[#allocation2] sm:$0xff] }
   0xe   :  { %s37_s12 = sshll.u32 %s94_s11, 4  ;;  %30 = vst [vmem:[#allocation5] sm:$0xff] %v26_v0  ;;  %s38_s12 = int_to_ptr.vmem [resolvable:$true] %s37_s12 }
   0xf   :  { %s69_s13 = scalar_lea.vmem %s38_s12, 128  ;;  %p74_p6 = scmp.lt.s32.totalorder %s38_s12, %s38_s12 }
  0x10   :  { %p70_p5 = scmp.ne.s32.totalorder %s38_s12, %s69_s13  ;;  %p75_p7 = scmp.lt.s32.totalorder %s69_s13, %s69_s13 }
  0x12   :  { %p76_p8 = por %p75_p7, %p74_p6 }
  0x14   :  { %p77_p9 = pnand %p76_p8, %p70_p5 }
  0x16   :  { %80 = shalt.err (!%p77_p9)
}
  0x17   :  { %40 = dma.vmem_to_hbm [thread:$0]  %s38_s12, 128, %s112_s1, [#allocation4]  }
  0x18   :  { %91 = dma.done.wait [#allocation4], 128  }
  0x19   :  { %92 = vsyncadd [#allocation4], 4294967168 }
  0x1a   :  { %44 = vsyncpa [#allocation3], 1 }
  0x1b   :  { %45 = vsyncpa [#allocation4], 1 }

</bundles_post_ra>
